<compile_context>
chip_gen: v6e
topology: v6e:2x2x1
jax: 0.10.0
libtpu: 0.0.40
codegen_flags: <defaults>
</compile_context>

<pallas_src>
import functools

import jax
import jax.numpy as jnp
from jax import lax
from jax.experimental import pallas as pl
from jax.experimental.pallas import tpu as pltpu


# ----------------------------------------------------------------------------
# Plain-JAX glue: FPS / ball query / gather (data-dependent, not kernelized)
# ----------------------------------------------------------------------------
def square_distance(src, dst):
    # src: [B, N, C], dst: [B, M, C] -> [B, N, M]
    dist = -2.0 * jnp.einsum("bnc,bmc->bnm", src, dst)
    dist = dist + jnp.sum(src**2, -1)[:, :, None]
    dist = dist + jnp.sum(dst**2, -1)[:, None, :]
    return dist


def farthest_point_sample(xyz, npoint, key):
    # xyz: [B, N, 3] -> [B, npoint] int32
    B, N, _ = xyz.shape
    farthest = jax.random.randint(key, (B,), 0, N, dtype=jnp.int32)
    distance = jnp.full((B, N), 1e10, dtype=jnp.float32)
    centroids = jnp.zeros((B, npoint), dtype=jnp.int32)
    batch_idx = jnp.arange(B)

    def body(i, carry):
        centroids, distance, farthest = carry
        centroids = centroids.at[:, i].set(farthest)
        centroid = xyz[batch_idx, farthest, :][:, None, :]        # [B,1,3]
        dist = jnp.sum((xyz - centroid) ** 2, -1)                  # [B,N]
        distance = jnp.minimum(distance, dist)
        farthest = jnp.argmax(distance, axis=-1).astype(jnp.int32)
        return centroids, distance, farthest

    centroids, _, _ = lax.fori_loop(0, npoint, body, (centroids, distance, farthest))
    return centroids


def index_points(points, idx):
    # points: [B, N, C], idx: [B, ...] -> [B, ..., C]
    B = points.shape[0]
    batch_idx = jnp.arange(B).reshape((B,) + (1,) * (idx.ndim - 1))
    return points[batch_idx, idx]


def query_ball_point(radius, nsample, xyz, new_xyz):
    # xyz: [B, N, 3], new_xyz: [B, S, 3] -> [B, S, nsample] int32
    B, N, _ = xyz.shape
    S = new_xyz.shape[1]
    sqrdists = square_distance(new_xyz, xyz)                       # [B,S,N]
    group_idx = jnp.broadcast_to(jnp.arange(N, dtype=jnp.int32), (B, S, N))
    group_idx = jnp.where(sqrdists > radius**2, jnp.int32(N), group_idx)
    group_idx = jnp.sort(group_idx, axis=-1)[:, :, :nsample]
    group_first = jnp.broadcast_to(group_idx[:, :, :1], (B, S, nsample))
    group_idx = jnp.where(group_idx == N, group_first, group_idx)
    return group_idx


# ----------------------------------------------------------------------------
# Pallas kernel: fused MLP chain on (tS*K, C) + max over K neighbors
# ----------------------------------------------------------------------------
def _msg_mlp_kernel(*refs, num_layers, tS, K):
    # refs = (grouped_ref, w0, b0, w1, b1, ..., out_ref)
    #   grouped_ref : (1, tS*K, C_in)   bf16   neighbors contiguous per point
    #   w_j         : (C_j, C_{j+1})    bf16   (last layer padded to lane width)
    #   b_j         : (1, C_{j+1})      f32
    #   out_ref     : (1, tS, c_pad)    f32
    g_ref = refs[0]
    out_ref = refs[-1]
    params = refs[1:-1]

    x = g_ref[0]                                            # (tS*K, C_in) bf16
    for j in range(num_layers):
        w = params[2 * j][...]                              # bf16 weights
        b = params[2 * j + 1][...]                          # f32 bias (added once)
        y = jnp.dot(x, w, preferred_element_type=jnp.float32) + b
        y = jnp.maximum(y, 0.0)                             # ReLU in f32
        x = y.astype(jnp.bfloat16) if j + 1 < num_layers else y

    c_pad = out_ref.shape[-1]
    # (tS*K, c_pad) -> (tS, K, c_pad); max over the K neighbors.
    out_ref[0] = jnp.max(x.reshape(tS, K, c_pad), axis=1)


def msg_mlp_max(grouped, weights, biases, *, s_tile=128, lane=128):
    """grouped: [B, S, K, C_in]; weights[j]: [C_in_j, C_out_j]; biases[j]: [1, C_out_j]
    Returns [B, S, C_last] float32."""
    B, S, K, C_in = grouped.shape
    num_layers = len(weights)
    c_last = weights[-1].shape[1]
    c_pad = pl.cdiv(c_last, lane) * lane                    # lane-dense output

    # bf16 MXU inputs; f32 accumulate happens inside the kernel.
    w_list = [w.astype(jnp.bfloat16) for w in weights]
    b_list = [b.astype(jnp.float32) for b in biases]
    if c_pad != c_last:
        w_list[-1] = jnp.pad(w_list[-1], ((0, 0), (0, c_pad - c_last)))
        b_list[-1] = jnp.pad(b_list[-1], ((0, 0), (0, c_pad - c_last)))

    # Tile S (VMEM budget: keeps blocks a few MiB even at realistic sizes).
    tS = S if S <= s_tile else s_tile
    S_pad = pl.cdiv(S, tS) * tS
    g = grouped.astype(jnp.bfloat16)
    if S_pad != S:
        g = jnp.pad(g, ((0, 0), (0, S_pad - S), (0, 0), (0, 0)))
    g = g.reshape(B, S_pad * K, C_in)                       # neighbors contiguous

    kernel = functools.partial(_msg_mlp_kernel, num_layers=num_layers, tS=tS, K=K)

    in_specs = [pl.BlockSpec((1, tS * K, C_in), lambda b, s: (b, s, 0))]
    args = [g]
    for w, bias in zip(w_list, b_list):
        in_specs.append(pl.BlockSpec(w.shape, lambda b, s: (0, 0)))   # resident
        in_specs.append(pl.BlockSpec(bias.shape, lambda b, s: (0, 0)))
        args.append(w)
        args.append(bias)

    out = pl.pallas_call(
        kernel,
        out_shape=jax.ShapeDtypeStruct((B, S_pad, c_pad), jnp.float32),
        grid=(B, S_pad // tS),
        in_specs=in_specs,
        out_specs=pl.BlockSpec((1, tS, c_pad), lambda b, s: (b, s, 0)),
        compiler_params=pltpu.CompilerParams(
            dimension_semantics=("parallel", "parallel"),
            vmem_limit_bytes=48 * 1024 * 1024,              # fits v7x's 64 MiB VMEM
        ),
    )(*args)
    return out[:, :S, :c_last]


# ----------------------------------------------------------------------------
# Module: PointNetSetAbstractionMsg (synthetic deterministic parameters)
# ----------------------------------------------------------------------------
class PointNetSetAbstractionMsg:
    def __init__(self, npoint, radius_list, nsample_list, in_channel, mlp_list, key):
        self.npoint = npoint
        self.radius_list = radius_list
        self.nsample_list = nsample_list
        self.eps = 1e-5
        self.folded_weights = []  # per scale: list of [C_in, C_out]
        self.folded_biases = []   # per scale: list of [1, C_out]

        for i in range(len(mlp_list)):
            ws, bs = [], []
            last_channel = in_channel + 3
            for out_channel in mlp_list[i]:
                key, k1, k2, k3, k4, k5, k6 = jax.random.split(key, 7)
                # Conv2d(last, out, 1) weight [out, last], bias [out]
                w = 0.2 * jax.random.normal(k1, (out_channel, last_channel), jnp.float32)
                b = 0.1 * jax.random.normal(k2, (out_channel,), jnp.float32)
                # BatchNorm2d params (running stats)
                gamma = 1.0 + 0.1 * jax.random.normal(k3, (out_channel,), jnp.float32)
                beta = 0.1 * jax.random.normal(k4, (out_channel,), jnp.float32)
                rmean = 0.05 * jax.random.normal(k5, (out_channel,), jnp.float32)
                rvar = jax.random.uniform(k6, (out_channel,), jnp.float32, 0.5, 1.5)
                # Fold BN into conv: y = ((Wx + b) - mean) * gamma/sqrt(var+eps) + beta
                s = gamma / jnp.sqrt(rvar + self.eps)
                w_eff = (w * s[:, None]).T                       # [C_in, C_out]
                b_eff = ((b - rmean) * s + beta)[None, :]        # [1, C_out]
                ws.append(w_eff)
                bs.append(b_eff)
                last_channel = out_channel
            self.folded_weights.append(ws)
            self.folded_biases.append(bs)

    def __call__(self, xyz, points, key):
        """xyz: [B, 3, N], points: [B, D, N] or None.
        Returns new_xyz [B, 3, S], new_points_concat [B, sum(mlp[-1]), S]."""
        xyz = jnp.transpose(xyz, (0, 2, 1))                       # [B, N, 3]
        if points is not None:
            points = jnp.transpose(points, (0, 2, 1))             # [B, N, D]
        B, N, C = xyz.shape
        S = self.npoint

        fps_idx = farthest_point_sample(xyz, S, key)              # [B, S]
        new_xyz = index_points(xyz, fps_idx)                      # [B, S, 3]

        new_points_list = []
        for i, radius in enumerate(self.radius_list):
            K = self.nsample_list[i]
            group_idx = query_ball_point(radius, K, xyz, new_xyz)  # [B, S, K]
            grouped_xyz = index_points(xyz, group_idx)             # [B, S, K, 3]
            grouped_xyz = grouped_xyz - new_xyz[:, :, None, :]
            if points is not None:
                grouped_points = index_points(points, group_idx)   # [B, S, K, D]
                grouped_points = jnp.concatenate([grouped_points, grouped_xyz], axis=-1)
            else:
                grouped_points = grouped_xyz
            # Hot path in Pallas: fused MLP chain + max over K  -> [B, S, C_last]
            new_points = msg_mlp_max(
                grouped_points.astype(jnp.float32),
                self.folded_weights[i],
                self.folded_biases[i],
            )
            new_points_list.append(new_points)

        new_xyz = jnp.transpose(new_xyz, (0, 2, 1))                # [B, 3, S]
        new_points_concat = jnp.concatenate(new_points_list, axis=-1)
        new_points_concat = jnp.transpose(new_points_concat, (0, 2, 1))  # [B, D', S]
        return new_xyz, new_points_concat


# ----------------------------------------------------------------------------
if __name__ == "__main__":
    key = jax.random.PRNGKey(0)
    k_xyz, k_pts, k_param, k_fps = jax.random.split(key, 4)

    B, N, D_in = 2, 16, 4
    npoint = 8
    radius_list = [0.3, 0.6]
    nsample_list = [8, 16]
    mlp_list = [[16, 32], [16, 32, 64]]

    xyz = jax.random.uniform(k_xyz, (B, 3, N), jnp.float32)        # [B, 3, N]
    points = jax.random.normal(k_pts, (B, D_in, N), jnp.float32)   # [B, D, N]

    module = PointNetSetAbstractionMsg(
        npoint, radius_list, nsample_list, D_in, mlp_list, k_param
    )

    new_xyz, new_points_concat = module(xyz, points, k_fps)
    jax.block_until_ready((new_xyz, new_points_concat))

    assert new_xyz.shape == (B, 3, npoint)
    assert new_points_concat.shape == (B, sum(m[-1] for m in mlp_list), npoint)
    assert bool(jnp.all(jnp.isfinite(new_points_concat)))
    print("KERNEL_OK")
</pallas_src>

<mosaic_0001>
module attributes {stable_mosaic.version = 11 : i64} {
  func.func @_msg_mlp_kernel(%arg0: i32, %arg1: i32, %arg2: memref<1x64x7xbf16, #tpu.memory_space<vmem>>, %arg3: memref<7x16xbf16, #tpu.memory_space<vmem>>, %arg4: memref<1x16xf32, #tpu.memory_space<vmem>>, %arg5: memref<16x128xbf16, #tpu.memory_space<vmem>>, %arg6: memref<1x128xf32, #tpu.memory_space<vmem>>, %arg7: memref<1x8x128xf32, #tpu.memory_space<vmem>>) attributes {dimension_semantics = [#tpu.dimension_semantics<parallel>, #tpu.dimension_semantics<parallel>], iteration_bounds = array<i64: 2, 1>, scalar_prefetch = 0 : i64, scratch_operands = 0 : i64, tpu.core_type = #tpu.core_type<tc>, window_params = [{transform_indices = @transform_0, window_bounds = array<i64: 1, 64, 7>}, {pipeline_mode = #tpu.pipeline_mode<synchronous>, transform_indices = @transform_1, window_bounds = array<i64: 7, 16>}, {pipeline_mode = #tpu.pipeline_mode<synchronous>, transform_indices = @transform_2, window_bounds = array<i64: 1, 16>}, {pipeline_mode = #tpu.pipeline_mode<synchronous>, transform_indices = @transform_3, window_bounds = array<i64: 16, 128>}, {pipeline_mode = #tpu.pipeline_mode<synchronous>, transform_indices = @transform_4, window_bounds = array<i64: 1, 128>}, {transform_indices = @transform_5, window_bounds = array<i64: 1, 8, 128>}]} {
    %c0 = arith.constant 0 : index
    %c0_0 = arith.constant 0 : index
    %c0_1 = arith.constant 0 : index
    %0 = vector.load %arg2[%c0, %c0_0, %c0_1] : memref<1x64x7xbf16, #tpu.memory_space<vmem>>, vector<1x64x7xbf16>
    %1 = vector.shape_cast %0 : vector<1x64x7xbf16> to vector<64x7xbf16>
    %c0_2 = arith.constant 0 : index
    %c0_3 = arith.constant 0 : index
    %2 = vector.load %arg3[%c0_2, %c0_3] : memref<7x16xbf16, #tpu.memory_space<vmem>>, vector<7x16xbf16>
    %c0_4 = arith.constant 0 : index
    %c0_5 = arith.constant 0 : index
    %3 = vector.load %arg4[%c0_4, %c0_5] : memref<1x16xf32, #tpu.memory_space<vmem>>, vector<1x16xf32>
    %cst = arith.constant dense<0.000000e+00> : vector<64x16xf32>
    %4 = tpu.matmul %1, %2, %cst {dimension_numbers = #tpu.dot_dimension_numbers<[1], [0], [0], [1], [0, 0, 1, 1], [], []>} : vector<64x7xbf16>, vector<7x16xbf16>, vector<64x16xf32> -> vector<64x16xf32>
    %5 = vector.broadcast %3 : vector<1x16xf32> to vector<64x16xf32>
    %6 = arith.addf %4, %5 : vector<64x16xf32>
    %cst_6 = arith.constant 0.000000e+00 : f32
    %7 = vector.broadcast %cst_6 : f32 to vector<64x16xf32>
    %8 = arith.maximumf %6, %7 : vector<64x16xf32>
    %9 = arith.truncf %8 : vector<64x16xf32> to vector<64x16xbf16>
    %c0_7 = arith.constant 0 : index
    %c0_8 = arith.constant 0 : index
    %10 = vector.load %arg5[%c0_7, %c0_8] : memref<16x128xbf16, #tpu.memory_space<vmem>>, vector<16x128xbf16>
    %c0_9 = arith.constant 0 : index
    %c0_10 = arith.constant 0 : index
    %11 = vector.load %arg6[%c0_9, %c0_10] : memref<1x128xf32, #tpu.memory_space<vmem>>, vector<1x128xf32>
    %cst_11 = arith.constant dense<0.000000e+00> : vector<64x128xf32>
    %12 = tpu.matmul %9, %10, %cst_11 {dimension_numbers = #tpu.dot_dimension_numbers<[1], [0], [0], [1], [0, 0, 1, 1], [], []>} : vector<64x16xbf16>, vector<16x128xbf16>, vector<64x128xf32> -> vector<64x128xf32>
    %13 = vector.broadcast %11 : vector<1x128xf32> to vector<64x128xf32>
    %14 = arith.addf %12, %13 : vector<64x128xf32>
    %cst_12 = arith.constant 0.000000e+00 : f32
    %15 = vector.broadcast %cst_12 : f32 to vector<64x128xf32>
    %16 = arith.maximumf %14, %15 : vector<64x128xf32>
    %17 = vector.shape_cast %16 : vector<64x128xf32> to vector<8x8x128xf32>
    %cst_13 = arith.constant dense<0xFF800000> : vector<8x128xf32>
    %18 = vector.multi_reduction <maximumf>, %17, %cst_13 [1] : vector<8x8x128xf32> to vector<8x128xf32>
    %c0_14 = arith.constant 0 : index
    %c0_15 = arith.constant 0 : index
    %c0_16 = arith.constant 0 : index
    %19 = vector.load %arg7[%c0_14, %c0_15, %c0_16] : memref<1x8x128xf32, #tpu.memory_space<vmem>>, vector<1x8x128xf32>
    %20 = vector.shape_cast %19 : vector<1x8x128xf32> to vector<8x128xf32>
    %21 = vector.shape_cast %18 : vector<8x128xf32> to vector<1x8x128xf32>
    tpu.vector_store %arg7[%c0_14, %c0_15, %c0_16], %21 {strides = array<i32>} : memref<1x8x128xf32, #tpu.memory_space<vmem>>, vector<1x8x128xf32>,
    return
  }
  func.func @transform_0(%arg0: i32, %arg1: i32) -> (i32, i32, i32) {
    %c0_i32 = arith.constant 0 : i32
    %c0_i32_0 = arith.constant 0 : i32
    return %arg0, %arg1, %c0_i32 : i32, i32, i32
  }
  func.func @transform_1(%arg0: i32, %arg1: i32) -> (i32, i32) {
    %c0_i32 = arith.constant 0 : i32
    %c0_i32_0 = arith.constant 0 : i32
    %c0_i32_1 = arith.constant 0 : i32
    return %c0_i32, %c0_i32_0 : i32, i32
  }
  func.func @transform_2(%arg0: i32, %arg1: i32) -> (i32, i32) {
    %c0_i32 = arith.constant 0 : i32
    %c0_i32_0 = arith.constant 0 : i32
    %c0_i32_1 = arith.constant 0 : i32
    return %c0_i32, %c0_i32_0 : i32, i32
  }
  func.func @transform_3(%arg0: i32, %arg1: i32) -> (i32, i32) {
    %c0_i32 = arith.constant 0 : i32
    %c0_i32_0 = arith.constant 0 : i32
    %c0_i32_1 = arith.constant 0 : i32
    return %c0_i32, %c0_i32_0 : i32, i32
  }
  func.func @transform_4(%arg0: i32, %arg1: i32) -> (i32, i32) {
    %c0_i32 = arith.constant 0 : i32
    %c0_i32_0 = arith.constant 0 : i32
    %c0_i32_1 = arith.constant 0 : i32
    return %c0_i32, %c0_i32_0 : i32, i32
  }
  func.func @transform_5(%arg0: i32, %arg1: i32) -> (i32, i32, i32) {
    %c0_i32 = arith.constant 0 : i32
    %c0_i32_0 = arith.constant 0 : i32
    return %arg0, %arg1, %c0_i32 : i32, i32, i32
  }
}

</mosaic_0001>

<bundles_post_ra>
// kernel: tpu_custom_call.1
= control target key start
LH: loop header
LB: loop body
LE: loop exit
PB: predicated region body
PF: predicated region fallthrough
CT: control target
= control target key end

     0   :  { %10 = vsyncpa [#allocation3], 0  ;;  %s1003_s0 = inlined_call_operand.vmem [shape: bf16[2,64,7], index: 0, kind: input, shape index: {}]   ;;  %s1004_s1 = inlined_call_operand.vmem [shape: bf16[7,16], index: 1, kind: input, shape index: {}]   ;;  %s1005_s2 = inlined_call_operand.vmem [shape: f32[1,16], index: 2, kind: input, shape index: {}]   ;;  %s1006_s3 = inlined_call_operand.vmem [shape: bf16[16,128], index: 3, kind: input, shape index: {}]   ;;  %s1007_s4 = inlined_call_operand.vmem [shape: f32[1,128], index: 4, kind: input, shape index: {}]   ;;  %s1008_s5 = inlined_call_operand.hbm [shape: f32[2,8,128], index: 5, kind: output, shape index: {}]  }
   0x1   :  { %12 = vsyncpa [#allocation3 + $0x1], 0  ;;  %s878_s18 = smov 0   ;;  %s880_s19 = smov 0  }
   0x2   :  { %s882_s20 = smov 0   ;;  %s884_s21 = smov 0  }
   0x3   :  { %s886_s22 = smov 0   ;;  %s888_s23 = smov 0  }
   0x4 LB: > { %s649_s24 = sadd.s32 4294967295, %s844_s23   ;;  %s650_s25 = sadd.s32 4294967294, %s844_s23   ;;  %s844_s23 = sphi %s888_s23, %s18_s23   ;;  %s840_s22 = sphi %s886_s22, %s1015_s22   ;;  %s836_s21 = sphi %s884_s21, %s1014_s21   ;;  %s832_s20 = sphi %s882_s20, %s1013_s20   ;;  %s828_s19 = sphi %s880_s19, %s1012_s19   ;;  %s824_s18 = sphi %s878_s18, %s1011_s18  }
   0x5   : > { %s30_s26 = sadd.s32 1, %s840_s22  ;;  %s151_s27 = sadd.s32 1, %s832_s20 }
   0x6   : > { %p32_p0 = scmp.ge.s32.totalorder %s30_s26, 2  ;;  %p161_p1 = scmp.ne.s32.totalorder %s832_s20, %s828_s19 }
   0x7   : > { %p162_p2 = scmp.eq.s32.totalorder %s649_s24, 1  ;;  %p167_p3 = scmp.ne.s32.totalorder %s828_s19, %s824_s18 }
   0x8   : > { %s1017_s26 = smov (%p32_p0, %s30_s26), 0  ;;  %p168_p5 = scmp.eq.s32.totalorder %s650_s25, 1 }
   0x9   : > { %p918_p4 = por %p162_p2, %p161_p1  ;;  %s146_s29 = ssub.s32 %s840_s22, %s1017_s26 }
   0xa   : > { %p653_p6 = scmp.ge.s32.totalorder %s844_s23, 1  ;;  %p149_p7 = scmp.eq.s32.totalorder %s146_s29, 0 }
   0xb   : > { %p925_p8 = por %p168_p5, %p167_p3  ;;  %p211_p9 = scmp.lt.s32.totalorder %s844_s23, 3 }
   0xc   : > { %s931_s6 = scalar_select %p149_p7, %s832_s20, %s151_s27  }
   0xd   : > { %p212_p10 = pnand %p653_p6, %p211_p9 }
   0xe   : > { %p244_p11 = scmp.lt.s32.totalorder (!%p212_p10), %s836_s21, 1  ;;  %s240_s27 = sand.u32 (!%p212_p10), 1, %s828_s19  }
   0xf   : > { %215 = sbr.rel (%p212_p10) target bundleno = 474 (0x1da), region = 40  ;;  %s654_s29 = sshll.u32 (!%p212_p10), %s240_s27, 3 }
  0x10   : > { %s673_s7 = sshll.u32 (!%p212_p10), %s836_s21, 7  ;;  %s242_s8 = scalar_lea.vmem (!%p212_p10), [#allocation2], %s654_s29 }
  0x11   : > { %s961_s12 = scalar_lea.hbm (!%p212_p10), %s1008_s5, %s673_s7  ;;  %s847_s14 = smov (!%p212_p10), [#allocation2]  }
  0x12   : > { %s772_s15 = sshll.u32 (!%p212_p10), %s847_s14, 4  ;;  %s773_s15 = int_to_ptr.vmem [resolvable:$false] %s772_s15 }
  0x13   : > { %s774_s16 = scalar_lea.vmem (!%p212_p10), %s773_s15, 256 }
  0x14   : > { %v262_v0 = vld [vmem:[%s1004_s1] sm:$0xf]  ;;  %vm303_vm0 = vcmask 1042432   ;;  %vm304_vm1 = vcmask 1043456   ;;  %v846_v1 = vmov 65535   ;;  %s245_s9 = scalar_select %p244_p11, %s836_s21, 1 }
  0x15   : > { %v305_v2 = vsel %vm303_vm0, 4294967295, %v846_v1  ;;  %vm290_vm2 = vcmask 56320   ;;  %v767_v9 = vld [vmem:[%s1006_s3] sm:$0xff]   ;;  %vm402_vm3 = vcmask 130048   ;;  %vm544_vm4 = vcmask 1041409  }
  0x16   : > { %v306_v3 = vsel %vm304_vm1, %v305_v2, 0  ;;  %s676_s10 = sshll.u32 %s245_s9, 5  ;;  %697 = vmatprep.subr.bf16.mxu1 %v767_v9  ;;  %v657_v12 = vld [vmem:[%s1005_s2] ss:$0 sm:$0xff]  ;;  %vm546_vm5 = vcmask 1042434   ;;  %vm548_vm6 = vcmask 1043459  }
  0x17   : > { %v308_v4 = vand.u32 %v306_v3, %v262_v0  ;;  %s251_s13 = scalar_lea.vmem %s1003_s0, %s676_s10  ;;  %698 = vmatpush3.bf16.msra.mxu1 %v767_v9  ;;  %v666_v39 = vld [vmem:[%s1007_s4] ss:$0 sm:$0xff]  ;;  %vm550_vm7 = vcmask 1044484   ;;  %vm552_vm8 = vcmask 1045509   ;;  %vm554_vm9 = vcmask 1046534   ;;  %s575_s9 = sshll.u32 %s242_s8, 4  ;;  %s576_s9 = int_to_ptr.vmem [resolvable:$true] %s575_s9 }
  0x18   : > { %v763_v5 = vld [vmem:[%s251_s13] sm:$0xff]   ;;  %v764_v6 = vld [vmem:[%s251_s13 + $0x8] sm:$0xff]   ;;  %v765_v7 = vld [vmem:[%s251_s13 + $0x10] sm:$0xff]   ;;  %vm556_vm10 = vcmask 1047559   ;;  %s768_s21 = scalar_lea.vmem %s576_s9, 128  ;;  %p775_p1 = scmp.lt.s32.totalorder %s576_s9, %s773_s15 }
  0x19   : > { %687 = vmatprep.subr.bf16.mxu0 %v308_v4  ;;  %689 = vmatprep.mubr.msk.bf16.mxu0 %vm290_vm2, %v763_v5  ;;  %v766_v8 = vld [vmem:[%s251_s13 + $0x18] sm:$0xff]   ;;  %s561_s13 = scalar_lea.sflag [#allocation3], %s240_s27  ;;  %p769_p12 = scmp.ne.s32.totalorder %s576_s9, %s768_s21 }
  0x1a   : > { %688 = vmatpush3.bf16.msra.mxu0 %v308_v4  ;;  %p776_p2 = scmp.lt.s32.totalorder %s774_s16, %s768_s21 }
  0x1b   : > { %p770_p13 = pnand %p769_p12, %p918_p4 }
  0x1c   : > { %p777_p3 = por %p776_p2, %p775_p1 }
  0x1d   : > { %690 = vmatmul.mubr.msk.bf16.vlgmr.msra.gmra.mxu0 %vm290_vm2, %v764_v6  ;;  %p771_p0 = pneg %p770_p13 }
  0x1e   : > { %693 = vmatprep.mubr.msk.bf16.mxu0 %vm290_vm2, %v765_v7 }
  0x1f   : > { %p778_p5 = pnand %p777_p3, %p771_p0 }
  0x25   : > { %694 = vmatmul.mubr.msk.bf16.gmra.mxu0 %vm290_vm2, %v766_v8 }
  0xdd   : > { %v691_v10 = vpop.f32.mrf.mxu0 }
  0xde   : > { %v353_v16 = vadd.f32 %v691_v10, %v657_v12 }
  0xdf   : > { %v344_v11 = vpop.f32.mrf.mxu0 }
  0xe0   : > { %v345_v14 = vadd.f32 %v657_v12, %v344_v11  ;;  %v377_v23 = vmax.f32 %v353_v16, 0.0 }
  0xe1   : > { %v692_v13 = vpop.f32.mrf.mxu0 }
  0xe2   : > { %v356_v15 = vadd.f32 %v692_v13, %v657_v12  ;;  %v375_v21 = vmax.f32 %v345_v14, 0.0 }
  0xe3   : > { %v347_v17 = vpop.f32.mrf.mxu0 }
  0xe4   : > { %v348_v18 = vadd.f32 %v657_v12, %v347_v17  ;;  %v378_v19 = vmax.f32 %v356_v15, 0.0 }
  0xe5   : > { %v695_v20 = vpop.f32.mrf.mxu0 }
  0xe6   : > { %v376_v22 = vmax.f32 %v348_v18, 0.0  ;;  %v384_v26 = vpack.c.bf16 %v378_v19, %v377_v23  ;;  %v369_v30 = vadd.f32 %v695_v20, %v657_v12 }
  0xe7   : > { %v360_v24 = vpop.f32.mrf.mxu0 }
  0xe8   : > { %v383_v25 = vpack.c.bf16 %v376_v22, %v375_v21  ;;  %v361_v28 = vadd.f32 %v657_v12, %v360_v24  ;;  %v381_v36 = vmax.f32 %v369_v30, 0.0 }
  0xe9   : > { %v696_v27 = vpop.f32.mrf.mxu0 }
  0xea   : > { %v372_v29 = vadd.f32 %v696_v27, %v657_v12  ;;  %699 = vmatprep.mubr.msk.bf16.mxu1 %vm402_vm3, %v383_v25  ;;  %v379_v34 = vmax.f32 %v361_v28, 0.0 }
  0xeb   : > { %v363_v31 = vpop.f32.mrf.mxu0  ;;  %700 = vmatmul.mubr.msk.bf16.vlgmr.msra.gmra.mxu1 %vm402_vm3, %v384_v26 }
  0xec   : > { %v364_v32 = vadd.f32 %v657_v12, %v363_v31  ;;  %v382_v33 = vmax.f32 %v372_v29, 0.0 }
  0xee   : > { %v380_v35 = vmax.f32 %v364_v32, 0.0  ;;  %v386_v38 = vpack.c.bf16 %v382_v33, %v381_v36 }
  0xf0   : > { %v385_v37 = vpack.c.bf16 %v380_v35, %v379_v34 }
  0xf2   : > { %703 = vmatprep.mubr.msk.bf16.mxu1 %vm402_vm3, %v385_v37 }
  0xf3   : > { %704 = vmatmul.mubr.msk.bf16.gmra.mxu1 %vm402_vm3, %v386_v38 }
 0x1ab   : > { %v701_v40 = vpop.f32.mrf.mxu1 }
 0x1ac   : > { %v458_v41 = vadd.f32 %v701_v40, %v666_v39 }
 0x1ad   : > { %v449_v42 = vpop.f32.mrf.mxu1 }
 0x1ae   : > { %v482_v43 = vmax.f32 %v458_v41, 0.0  ;;  %v450_v44 = vadd.f32 %v666_v39, %v449_v42 }
 0x1af   : > { %v702_v45 = vpop.f32.mrf.mxu1 }
 0x1b0   : > { %v500_v46 = vrot.slane %v482_v43, 4  ;;  %v480_v47 = vmax.f32 %v450_v44, 0.0  ;;  %v461_v48 = vadd.f32 %v702_v45, %v666_v39 }
 0x1b1   : > { %v452_v49 = vpop.f32.mrf.mxu1 }
 0x1b2   : > { %v501_v50 = vmax.f32 %v482_v43, %v500_v46  ;;  %v488_v51 = vrot.slane %v480_v47, 4  ;;  %v483_v52 = vmax.f32 %v461_v48, 0.0  ;;  %v453_v53 = vadd.f32 %v666_v39, %v452_v49 }
 0x1b3   : > { %v705_v54 = vpop.f32.mrf.mxu1 }
 0x1b4   : > { %v489_v55 = vmax.f32 %v480_v47, %v488_v51  ;;  %v506_v56 = vrot.slane %v483_v52, 4  ;;  %v481_v57 = vmax.f32 %v453_v53, 0.0  ;;  %v474_v58 = vadd.f32 %v705_v54, %v666_v39 }
 0x1b5   : > { %v465_v59 = vpop.f32.mrf.mxu1  ;;  %v502_v60 = vrot.slane %v501_v50, 2 }
 0x1b6   : > { %v490_v61 = vrot.slane %v489_v55, 2  ;;  %v507_v62 = vmax.f32 %v483_v52, %v506_v56  ;;  %v494_v63 = vrot.slane %v481_v57, 4  ;;  %v486_v0 = vmax.f32 %v474_v58, 0.0 }
 0x1b7   : > { %v466_v1 = vadd.f32 %v666_v39, %v465_v59  ;;  %v706_v2 = vpop.f32.mrf.mxu1  ;;  %v503_v9 = vmax.f32 %v501_v50, %v502_v60 }
 0x1b8   : > { %v491_v3 = vmax.f32 %v489_v55, %v490_v61  ;;  %v495_v4 = vmax.f32 %v481_v57, %v494_v63  ;;  %v524_v5 = vrot.slane %v486_v0, 4  ;;  %v477_v7 = vadd.f32 %v706_v2, %v666_v39 }
 0x1b9   : > { %v484_v6 = vmax.f32 %v466_v1, 0.0  ;;  %v468_v8 = vpop.f32.mrf.mxu1  ;;  %v508_v10 = vrot.slane %v507_v62, 2  ;;  %v504_v21 = vrot.slane %v503_v9, 1 }
 0x1ba   : > { %v496_v11 = vrot.slane %v495_v4, 2  ;;  %v525_v12 = vmax.f32 %v486_v0, %v524_v5  ;;  %v487_v14 = vmax.f32 %v477_v7, 0.0  ;;  %v469_v15 = vadd.f32 %v666_v39, %v468_v8 }
 0x1bb   : > { %v512_v13 = vrot.slane %v484_v6, 4  ;;  %v492_v16 = vrot.slane %v491_v3, 1  ;;  %v509_v22 = vmax.f32 %v507_v62, %v508_v10  ;;  %v505_v35 = vmax.f32 %v503_v9, %v504_v21 }
 0x1bc   : > { %v497_v17 = vmax.f32 %v495_v4, %v496_v11  ;;  %v530_v19 = vrot.slane %v487_v14, 4  ;;  %v485_v20 = vmax.f32 %v469_v15, 0.0  ;;  %v526_v24 = vrot.slane %v525_v12, 2 }
 0x1bd   : > { %v513_v18 = vmax.f32 %v484_v6, %v512_v13  ;;  %v493_v28 = vmax.f32 %v491_v3, %v492_v16  ;;  %v510_v33 = vrot.slane %v509_v22, 1 }
 0x1be   : > { %v498_v23 = vrot.slane %v497_v17, 1  ;;  %v531_v26 = vmax.f32 %v487_v14, %v530_v19  ;;  %v518_v27 = vrot.slane %v485_v20, 4  ;;  %v527_v36 = vmax.f32 %v525_v12, %v526_v24 }
 0x1bf   : > { %v514_v25 = vrot.slane %v513_v18, 2  ;;  %v511_v41 = vmax.f32 %v509_v22, %v510_v33 }
 0x1c0   : > { %v499_v29 = vmax.f32 %v497_v17, %v498_v23  ;;  %v532_v31 = vrot.slane %v531_v26, 2  ;;  %v519_v32 = vmax.f32 %v485_v20, %v518_v27  ;;  %v528_v43 = vrot.slane %v527_v36, 1 }
 0x1c1   : > { %v515_v30 = vmax.f32 %v513_v18, %v514_v25 }
 0x1c2   : > { %v545_v34 = vsel %vm544_vm4, %v499_v29, %v493_v28  ;;  %v533_v38 = vmax.f32 %v531_v26, %v532_v31  ;;  %v520_v39 = vrot.slane %v519_v32, 2  ;;  %v529_v49 = vmax.f32 %v527_v36, %v528_v43 }
 0x1c3   : > { %v516_v37 = vrot.slane %v515_v30, 1  ;;  %v547_v40 = vsel %vm546_vm5, %v505_v35, %v545_v34 }
 0x1c4   : > { %v521_v42 = vmax.f32 %v519_v32, %v520_v39  ;;  %v534_v45 = vrot.slane %v533_v38, 1  ;;  %v549_v47 = vsel %vm548_vm6, %v511_v41, %v547_v40 }
 0x1c5   : > { %v517_v44 = vmax.f32 %v515_v30, %v516_v37 }
 0x1c6   : > { %v522_v46 = vrot.slane %v521_v42, 1  ;;  %v535_v51 = vmax.f32 %v533_v38, %v534_v45 }
 0x1c7   : > { %v551_v50 = vsel %vm550_vm7, %v517_v44, %v549_v47 }
 0x1c8   : > { %v523_v48 = vmax.f32 %v521_v42, %v522_v46 }
 0x1ca   : > { %v553_v52 = vsel %vm552_vm8, %v523_v48, %v551_v50 }
 0x1cb   : > { %v555_v53 = vsel %vm554_vm9, %v529_v49, %v553_v52 }
 0x1cc   : > { %v557_v54 = vsel %vm556_vm10, %v535_v51, %v555_v53 }
 0x1cd   : > { %559 = vst [vmem:[%s242_s8] sm:$0xff] %v557_v54 }
 0x1ce   : > { %781 = shalt.err (!%p778_p5)
}
 0x1cf   : > { %s782_s17 = scalar_lea.hbm %s961_s12, 128  ;;  %s786_s27 = scalar_lea.hbm %s1008_s5, 256 }
 0x1d0   : > { %p783_p6 = scmp.ne.s32.totalorder %s961_s12, %s782_s17  ;;  %p787_p10 = scmp.lt.s32.totalorder %s961_s12, %s1008_s5 }
 0x1d1   : > { %p788_p11 = scmp.lt.s32.totalorder %s786_s27, %s782_s17 }
 0x1d2   : > { %p784_p7 = pnand %p783_p6, %p918_p4 }
 0x1d3   : > { %p789_p12 = por %p788_p11, %p787_p10 }
 0x1d4   : > { %p785_p9 = pneg %p784_p7 }
 0x1d6   : > { %p790_p13 = pnand %p789_p12, %p785_p9 }
 0x1d8   : > { %793 = shalt.err (!%p790_p13)
}
 0x1d9   : > { %707 = dma.vmem_to_hbm [thread:$0]  (%p918_p4), %s576_s9, 128, %s961_s12, %s561_s13  }
 0x1da PF: > { %p713_p0 = scmp.ge.s32.totalorder %s844_s23, 2  ;;  %s587_s8 = sand.u32 1, %s824_s18  }
 0x1db   : > { %s588_s10 = scalar_lea.sflag [#allocation3], %s587_s8 }
 0x1dc   : > { %p710_p1 = pnand %p713_p0, %p925_p8 }
 0x1de   : > { %p711_p2 = pneg %p710_p1 }
 0x1e0   : > { %819 = dma.done.wait (%p711_p2), %s588_s10, 128  }
 0x1e1   : > { %821 = vsyncadd (%p711_p2), %s588_s10, 4294967168  ;;  %s18_s23 = sadd.s32 1, %s844_s23   ;;  %s1011_s18 = smov %s828_s19 }
 0x1e2   : > { %p15_p3 = scmp.ge.s32.totalorder %s18_s23, 4   ;;  %s1012_s19 = smov %s832_s20 }
 0x1e3   : > { %s1013_s20 = smov %s931_s6  ;;  %s1014_s21 = smov %s840_s22 }
 0x1e4   : > { %s1015_s22 = smov %s1017_s26  ;;  %17 = sbr.rel (!%p15_p3) target bundleno = 4 (0x4), region = 75 }
 0x1e9   :  { %593 = vsyncpa [#allocation3], 1 }
 0x1ea   :  { %595 = vsyncpa [#allocation3 + $0x1], 1 }

</bundles_post_ra>
